<compile_context>
chip_gen: v5e
topology: v5e:2x2
jax: 0.10.0
libtpu: 0.0.40
codegen_flags: <defaults>
</compile_context>

<pallas_src>
import jax
import jax.numpy as jnp
from jax.experimental import pallas as pl
from jax.experimental.pallas import tpu as pltpu


_LANES = 128        # lane-dense last dim -> unmasked vector loads
_TR_MAX = 2048      # (2048, 128) f32 block = 1 MiB
_NUM_SPLITS = 2     # leading "parallel" axis -> v7x's 2 TensorCores


def _round_up(a, b):
    return -(-a // b) * b


def _cdiv(a, b):
    return -(-a // b)


def _make_minmax_kernel(rows, tr, nb, steps, need_mask):
    """Build the kernel with the (static) tiling baked into the closure."""

    def kernel(x_ref, mn_out_ref, mx_out_ref, mn_acc, mx_acc):
        c = pl.program_id(0)                      # core split (parallel)
        i = pl.program_id(1)                      # reduction step (arbitrary)
        x = x_ref[...].astype(jnp.float32)        # native-dtype DMA, f32 math

        if need_mask:
            # Last row block overhangs `rows`; mask the garbage rows.
            blk = jnp.minimum(c * steps + i, nb - 1)      # same clamp as index_map
            row = blk * tr + jax.lax.broadcasted_iota(jnp.int32, x.shape, 0)
            valid = row < rows
            x_min = jnp.where(valid, x, jnp.inf)
            x_max = jnp.where(valid, x, -jnp.inf)
        else:
            x_min = x
            x_max = x

        @pl.when(i == 0)
        def _():                                  # init accumulators per split
            mn_acc[...] = jnp.full_like(mn_acc, jnp.inf)
            mx_acc[...] = jnp.full_like(mx_acc, -jnp.inf)

        # Pure elementwise VPU work per step (mem-bound regime).
        mn_acc[...] = jnp.minimum(mn_acc[...], x_min)
        mx_acc[...] = jnp.maximum(mx_acc[...], x_max)

        @pl.when(i == pl.num_programs(1) - 1)
        def _():                                  # single cross-lane reduce, last step
            mn_out_ref[0] = jnp.min(mn_acc[...], keepdims=True)
            mx_out_ref[0] = jnp.max(mx_acc[...], keepdims=True)

    return kernel


@jax.jit
def range_minmax(x):
    """Global (min, max) of x via a tiled, double-buffered Pallas reduction."""
    dtype = x.dtype
    flat = x.reshape(-1)                          # free reshape (row-major bitcast)
    n = flat.shape[0]

    # Lane-dense layout.  Only a non-multiple-of-128 numel pays a pad copy;
    # 'edge' padding copies real values so min/max are unchanged.
    n_pad = _round_up(n, _LANES)
    if n_pad != n:
        # TODO(synk): ragged tail (numel % 128 != 0) costs one XLA pad copy.
        flat = jnp.pad(flat, (0, n_pad - n), mode="edge")
    rows = n_pad // _LANES
    x2 = flat.reshape(rows, _LANES)               # free reshape

    # Row tile: full extent for small inputs (always a legal block shape),
    # otherwise _TR_MAX (multiple of 8/16/32 sublanes for f32/bf16/int8).
    tr = rows if rows <= _TR_MAX else _TR_MAX
    nb = _cdiv(rows, tr)                          # total row blocks
    splits = min(_NUM_SPLITS, nb)                 # core splits actually used
    steps = _cdiv(nb, splits)                     # reduction steps per split
    need_mask = (rows % tr) != 0                  # static: mask only if ragged

    kernel = _make_minmax_kernel(rows, tr, nb, steps, need_mask)

    mn_parts, mx_parts = pl.pallas_call(
        kernel,
        out_shape=(jax.ShapeDtypeStruct((splits, 1, 1), jnp.float32),
                   jax.ShapeDtypeStruct((splits, 1, 1), jnp.float32)),
        grid=(splits, steps),
        in_specs=[pl.BlockSpec(
            (tr, _LANES),
            # Clamp so the DMA never goes out of bounds; a clamped duplicate
            # block re-reads real data, which is idempotent for min/max.
            lambda c, i: (jnp.minimum(c * steps + i, nb - 1), 0))],
        out_specs=(pl.BlockSpec((1, 1, 1), lambda c, i: (c, 0, 0)),
                   pl.BlockSpec((1, 1, 1), lambda c, i: (c, 0, 0))),
        scratch_shapes=[pltpu.VMEM((tr, _LANES), jnp.float32),
                        pltpu.VMEM((tr, _LANES), jnp.float32)],
        compiler_params=pltpu.CompilerParams(
            dimension_semantics=("parallel", "arbitrary")),
    )(x2)

    # Tiny combine across the (at most 2) per-split partials.
    mn = jnp.min(mn_parts).astype(dtype)
    mx = jnp.max(mx_parts).astype(dtype)
    return mn, mx


class RangeTracker:
    """Pallas-backed port of the PyTorch RangeTracker module."""

    def __init__(self, momentum=0.1):
        self.min_val = jnp.zeros((), jnp.float32)
        self.max_val = jnp.zeros((), jnp.float32)
        self.momentum = momentum
        self.max_vals = []
        self.min_vals = []

    def __call__(self, x):
        return self.forward(x)

    def forward(self, x):
        min_val, max_val = range_minmax(x)          # Pallas reduction kernel
        self.max_vals.append(float(max_val))        # mirrors .item() bookkeeping
        self.min_vals.append(float(min_val))
        self.update_range(min_val, max_val)

    def update_range(self, min_val, max_val):
        # Host-side scalar logic on two values, mirroring the PyTorch module
        # exactly (first call: tracked min == max == 0 -> adopt new range).
        if bool(self.min_val == self.max_val):
            self.min_val = min_val
            self.max_val = max_val
            return
        m = self.momentum
        self.min_val = self.min_val * (1 - m) + min_val * m
        self.max_val = self.max_val * (1 - m) + max_val * m


if __name__ == "__main__":
    key = jax.random.PRNGKey(0)
    k1, k2, k3 = jax.random.split(key, 3)

    tracker = RangeTracker(momentum=0.1)

    # 1) First call: adopts (min, max) of x.  2048 elems -> zero-copy path.
    x = jax.random.normal(k1, (2, 4, 16, 16), dtype=jnp.float32)
    tracker(x)
    jax.block_until_ready((tracker.min_val, tracker.max_val))
    assert jnp.allclose(tracker.min_val, jnp.min(x), atol=1e-6, rtol=0)
    assert jnp.allclose(tracker.max_val, jnp.max(x), atol=1e-6, rtol=0)

    # 2) Second call: EMA branch + ragged numel (2*3*7*7 = 294) -> tail-pad path.
    y = jax.random.normal(k2, (2, 3, 7, 7), dtype=jnp.float32) * 2.0 + 0.5
    prev_mn, prev_mx = tracker.min_val, tracker.max_val
    tracker(y)
    jax.block_until_ready((tracker.min_val, tracker.max_val))
    ref_mn = prev_mn * 0.9 + jnp.min(y) * 0.1
    ref_mx = prev_mx * 0.9 + jnp.max(y) * 0.1
    assert jnp.allclose(tracker.min_val, ref_mn, atol=1e-6, rtol=1e-6)
    assert jnp.allclose(tracker.max_val, ref_mx, atol=1e-6, rtol=1e-6)
    assert len(tracker.min_vals) == 2 and len(tracker.max_vals) == 2

    # 3) Multi-block + in-kernel row mask + 2-way split path
    #    (675840 elems -> rows=5280, tr=2048, nb=3, splits=2, masked last block).
    z = jax.random.normal(k3, (8, 40, 33, 64), dtype=jnp.float32)
    mn, mx = range_minmax(z)
    jax.block_until_ready((mn, mx))
    assert jnp.allclose(mn, jnp.min(z), atol=1e-6, rtol=0)
    assert jnp.allclose(mx, jnp.max(z), atol=1e-6, rtol=0)

    print("KERNEL_OK")
</pallas_src>

<mosaic_0001>
module attributes {stable_mosaic.version = 11 : i64} {
  func.func @kernel(%arg0: i32, %arg1: i32, %arg2: memref<16x128xf32, #tpu.memory_space<vmem>>, %arg3: memref<1x1x1xf32, #tpu.memory_space<vmem>>, %arg4: memref<1x1x1xf32, #tpu.memory_space<vmem>>, %arg5: memref<16x128xf32, #tpu.memory_space<vmem>>, %arg6: memref<16x128xf32, #tpu.memory_space<vmem>>) attributes {dimension_semantics = [#tpu.dimension_semantics<parallel>, #tpu.dimension_semantics<arbitrary>], iteration_bounds = array<i64: 1, 1>, scalar_prefetch = 0 : i64, scratch_operands = 2 : i64, tpu.core_type = #tpu.core_type<tc>, window_params = [{transform_indices = @transform_0, window_bounds = array<i64: 16, 128>}, {transform_indices = @transform_1, window_bounds = array<i64: 1, 1, 1>}, {transform_indices = @transform_2, window_bounds = array<i64: 1, 1, 1>}]} {
    %c0 = arith.constant 0 : index
    %c0_0 = arith.constant 0 : index
    %0 = vector.load %arg2[%c0, %c0_0] : memref<16x128xf32, #tpu.memory_space<vmem>>, vector<16x128xf32>
    %c0_i32 = arith.constant 0 : i32
    %1 = arith.cmpi eq, %arg1, %c0_i32 : i32
    %2 = arith.extui %1 : i1 to i32
    %c0_i32_1 = arith.constant 0 : i32
    %3 = arith.cmpi ne, %2, %c0_i32_1 : i32
    scf.if %3 {
      %cst = arith.constant 0x7F800000 : f32
      %13 = vector.broadcast %cst : f32 to vector<16x128xf32>
      %c0_12 = arith.constant 0 : index
      %c0_13 = arith.constant 0 : index
      %14 = vector.load %arg5[%c0_12, %c0_13] : memref<16x128xf32, #tpu.memory_space<vmem>>, vector<16x128xf32>
      tpu.vector_store %arg5[%c0_12, %c0_13], %13 {strides = array<i32>} : memref<16x128xf32, #tpu.memory_space<vmem>>, vector<16x128xf32>,
      %cst_14 = arith.constant 0xFF800000 : f32
      %15 = vector.broadcast %cst_14 : f32 to vector<16x128xf32>
      %c0_15 = arith.constant 0 : index
      %c0_16 = arith.constant 0 : index
      %16 = vector.load %arg6[%c0_15, %c0_16] : memref<16x128xf32, #tpu.memory_space<vmem>>, vector<16x128xf32>
      tpu.vector_store %arg6[%c0_15, %c0_16], %15 {strides = array<i32>} : memref<16x128xf32, #tpu.memory_space<vmem>>, vector<16x128xf32>,
    } else {
    }
    %c0_2 = arith.constant 0 : index
    %c0_3 = arith.constant 0 : index
    %4 = vector.load %arg5[%c0_2, %c0_3] : memref<16x128xf32, #tpu.memory_space<vmem>>, vector<16x128xf32>
    %5 = arith.minimumf %4, %0 : vector<16x128xf32>
    %c0_4 = arith.constant 0 : index
    %c0_5 = arith.constant 0 : index
    %6 = vector.load %arg5[%c0_4, %c0_5] : memref<16x128xf32, #tpu.memory_space<vmem>>, vector<16x128xf32>
    tpu.vector_store %arg5[%c0_4, %c0_5], %5 {strides = array<i32>} : memref<16x128xf32, #tpu.memory_space<vmem>>, vector<16x128xf32>,
    %c0_6 = arith.constant 0 : index
    %c0_7 = arith.constant 0 : index
    %7 = vector.load %arg6[%c0_6, %c0_7] : memref<16x128xf32, #tpu.memory_space<vmem>>, vector<16x128xf32>
    %8 = arith.maximumf %7, %0 : vector<16x128xf32>
    %c0_8 = arith.constant 0 : index
    %c0_9 = arith.constant 0 : index
    %9 = vector.load %arg6[%c0_8, %c0_9] : memref<16x128xf32, #tpu.memory_space<vmem>>, vector<16x128xf32>
    tpu.vector_store %arg6[%c0_8, %c0_9], %8 {strides = array<i32>} : memref<16x128xf32, #tpu.memory_space<vmem>>, vector<16x128xf32>,
    %c0_i32_10 = arith.constant 0 : i32
    %10 = arith.cmpi eq, %arg1, %c0_i32_10 : i32
    %11 = arith.extui %10 : i1 to i32
    %c0_i32_11 = arith.constant 0 : i32
    %12 = arith.cmpi ne, %11, %c0_i32_11 : i32
    scf.if %12 {
      %c0_12 = arith.constant 0 : index
      %c0_13 = arith.constant 0 : index
      %13 = vector.load %arg5[%c0_12, %c0_13] : memref<16x128xf32, #tpu.memory_space<vmem>>, vector<16x128xf32>
      %14 = vector.shape_cast %13 : vector<16x128xf32> to vector<1x16x128xf32>
      %cst = arith.constant dense<0x7F800000> : vector<1xf32>
      %15 = vector.multi_reduction <minimumf>, %14, %cst [1, 2] : vector<1x16x128xf32> to vector<1xf32>
      %16 = vector.shape_cast %15 : vector<1xf32> to vector<1x1x1xf32>
      %17 = vector.extract %16[0, 0, 0] : f32 from vector<1x1x1xf32>
      %18 = vector.broadcast %17 : f32 to vector<1x1xf32>
      %c0_14 = arith.constant 0 : index
      %c0_15 = arith.constant 0 : index
      %c0_16 = arith.constant 0 : index
      %19 = vector.load %arg3[%c0_14, %c0_15, %c0_16] : memref<1x1x1xf32, #tpu.memory_space<vmem>>, vector<1x1x1xf32>
      %20 = vector.shape_cast %19 : vector<1x1x1xf32> to vector<1x1xf32>
      %21 = vector.shape_cast %18 : vector<1x1xf32> to vector<1x1x1xf32>
      tpu.vector_store %arg3[%c0_14, %c0_15, %c0_16], %21 {strides = array<i32>} : memref<1x1x1xf32, #tpu.memory_space<vmem>>, vector<1x1x1xf32>,
      %c0_17 = arith.constant 0 : index
      %c0_18 = arith.constant 0 : index
      %22 = vector.load %arg6[%c0_17, %c0_18] : memref<16x128xf32, #tpu.memory_space<vmem>>, vector<16x128xf32>
      %23 = vector.shape_cast %22 : vector<16x128xf32> to vector<1x16x128xf32>
      %cst_19 = arith.constant dense<0xFF800000> : vector<1xf32>
      %24 = vector.multi_reduction <maximumf>, %23, %cst_19 [1, 2] : vector<1x16x128xf32> to vector<1xf32>
      %25 = vector.shape_cast %24 : vector<1xf32> to vector<1x1x1xf32>
      %26 = vector.extract %25[0, 0, 0] : f32 from vector<1x1x1xf32>
      %27 = vector.broadcast %26 : f32 to vector<1x1xf32>
      %c0_20 = arith.constant 0 : index
      %c0_21 = arith.constant 0 : index
      %c0_22 = arith.constant 0 : index
      %28 = vector.load %arg4[%c0_20, %c0_21, %c0_22] : memref<1x1x1xf32, #tpu.memory_space<vmem>>, vector<1x1x1xf32>
      %29 = vector.shape_cast %28 : vector<1x1x1xf32> to vector<1x1xf32>
      %30 = vector.shape_cast %27 : vector<1x1xf32> to vector<1x1x1xf32>
      tpu.vector_store %arg4[%c0_20, %c0_21, %c0_22], %30 {strides = array<i32>} : memref<1x1x1xf32, #tpu.memory_space<vmem>>, vector<1x1x1xf32>,
    } else {
    }
    return
  }
  func.func @transform_0(%arg0: i32, %arg1: i32) -> (i32, i32) {
    %c1_i32 = arith.constant 1 : i32
    %0 = arith.muli %arg0, %c1_i32 : i32
    %1 = arith.addi %0, %arg1 : i32
    %c0_i32 = arith.constant 0 : i32
    %2 = arith.minsi %1, %c0_i32 : i32
    %c0_i32_0 = arith.constant 0 : i32
    %c0_i32_1 = arith.constant 0 : i32
    return %2, %c0_i32_0 : i32, i32
  }
  func.func @transform_1(%arg0: i32, %arg1: i32) -> (i32, i32, i32) {
    %c0_i32 = arith.constant 0 : i32
    %c0_i32_0 = arith.constant 0 : i32
    %c0_i32_1 = arith.constant 0 : i32
    return %arg0, %c0_i32, %c0_i32_0 : i32, i32, i32
  }
  func.func @transform_2(%arg0: i32, %arg1: i32) -> (i32, i32, i32) {
    %c0_i32 = arith.constant 0 : i32
    %c0_i32_0 = arith.constant 0 : i32
    %c0_i32_1 = arith.constant 0 : i32
    return %arg0, %c0_i32, %c0_i32_0 : i32, i32, i32
  }
}

</mosaic_0001>

<bundles_post_ra>
// kernel: range_minmax.1
= control target key start
LH: loop header
LB: loop body
LE: loop exit
PB: predicated region body
PF: predicated region fallthrough
CT: control target
= control target key end

     0   :  { %8 = vsyncpa [#allocation5], 0  ;;  %s223_s0 = inlined_call_operand.vmem [shape: f32[16,128], index: 0, kind: input, shape index: {}]   ;;  %s224_s1 = inlined_call_operand.hbm [shape: f32[1,1,1], index: 1, kind: output, shape index: {0}]   ;;  %s225_s2 = inlined_call_operand.hbm [shape: f32[1,1,1], index: 2, kind: output, shape index: {1}]  }
   0x1   :  { %v44_v0 = vld [vmem:[%s223_s0] sm:$0xff]  ;;  %v45_v1 = vld [vmem:[%s223_s0 + $0x8] sm:$0xff] }
   0x2   :  { %9 = vsyncpa [#allocation7], 0  ;;  %v71_v2 = vmin.f32 %v44_v0, %v45_v1  ;;  %v86_v3 = vmax.f32 %v44_v0, %v45_v1  ;;  %s194_s0 = smov [#allocation4]   ;;  %s105_s16 = sshll.u32 %s224_s1, 4  ;;  %vm82_vm0 = vcmask 0   ;;  %s106_s16 = int_to_ptr.hbm [resolvable:$true] %s105_s16 }
   0x3   :  { %s103_s13 = sshll.u32 %s194_s0, 4  ;;  %s195_s18 = smov [#allocation6]   ;;  %s104_s13 = int_to_ptr.vmem [resolvable:$true] %s103_s13 }
   0x4   :  { %72 = vmin.xlane.f32.xlu0 %v71_v2  ;;  %s114_s19 = sshll.u32 %s195_s18, 4  ;;  %s116_s22 = sshll.u32 %s225_s2, 4  ;;  %s115_s19 = int_to_ptr.vmem [resolvable:$true] %s114_s19  ;;  %s117_s22 = int_to_ptr.hbm [resolvable:$true] %s116_s22 }
   0xc   :  { %87 = vmax.xlane.f32.xlu0 %v86_v3 }
  0x77   :  { %v73_v4 = vpop.xlane.xlu0 %72 }
  0x78   :  { %v74_v5 = vrot.slane %v73_v4, 4 }
  0x7a   :  { %v75_v6 = vmin.f32 %v73_v4, %v74_v5 }
  0x7c   :  { %v76_v7 = vrot.slane %v75_v6, 2 }
  0x7e   :  { %v77_v8 = vmin.f32 %v75_v6, %v76_v7 }
  0x7f   :  { %v88_v9 = vpop.xlane.xlu0 %87 }
  0x80   :  { %v89_v10 = vrot.slane %v88_v9, 4  ;;  %v78_v11 = vrot.slane %v77_v8, 1 }
  0x82   :  { %v90_v12 = vmax.f32 %v88_v9, %v89_v10  ;;  %v79_v13 = vmin.f32 %v77_v8, %v78_v11 }
  0x84   :  { %v91_v14 = vrot.slane %v90_v12, 2  ;;  %136 = vpush %v79_v13 }
  0x86   :  { %v92_v15 = vmax.f32 %v90_v12, %v91_v14 }
  0x88   :  { %v93_v16 = vrot.slane %v92_v15, 1 }
  0x8a   :  { %v94_v17 = vmax.f32 %v92_v15, %v93_v16 }
  0x8c   :  { %138 = vpush %v94_v17 }
  0xb5   :  { %s137_s17 = spop %136 }
  0xb6   :  { %v81_v18 = vstv %s137_s17 }
  0xb7   :  { %83 = vst.msk [vmem:[#allocation4] sm:$0x1] %vm82_vm0, %v81_v18 }
  0xb8   :  { %108 = dma.vmem_to_hbm [thread:$0]  %s104_s13, 16, %s106_s16, [#allocation5]  }
  0xbd   :  { %s139_s23 = spop %138 }
  0xbe   :  { %v96_v19 = vstv %s139_s23 }
  0xbf   :  { %97 = vst.msk [vmem:[#allocation6] sm:$0x1] %vm82_vm0, %v96_v19 }
  0xc0   :  { %119 = dma.vmem_to_hbm [thread:$0]  %s115_s19, 16, %s117_s22, [#allocation7]  }
  0xc1   :  { %190 = dma.done.wait [#allocation5], 16  }
  0xc2   :  { %191 = vsyncadd [#allocation5], 4294967280 }
  0xc3   :  { %192 = dma.done.wait [#allocation7], 16  }
  0xc4   :  { %193 = vsyncadd [#allocation7], 4294967280 }
  0xc5   :  { %128 = vsyncpa [#allocation5], 1 }
  0xc6   :  { %129 = vsyncpa [#allocation7], 1 }

</bundles_post_ra>
